<compile_context>
chip_gen: v7x
topology: tpu7x:2x2x1
jax: 0.10.0
libtpu: 0.0.40
codegen_flags: <defaults>
</compile_context>

<pallas_src>
import functools

import jax
import jax.numpy as jnp
from jax.experimental import pallas as pl
from jax.experimental.pallas import tpu as pltpu


def _rnn_net_kernel(x_ref, w_ih0_ref, w_hh0_ref, w_ihr_ref, w_hhr_ref, b_ref,
                    w_fc_ref, b_fc_ref, bins_ref, out_ref,
                    *, num_layers, batch_pad):
    """Whole forward: RNN recurrence + fc + seq-normalization + bins reduce."""
    TB, _ = x_ref.shape
    B = batch_pad                          # sublane-aligned (multiple of 8)
    T = TB // B
    H = w_hh0_ref.shape[0]

    # ---- layer-0 input projection for ALL timesteps: one batched matmul (+ bias). ----
    xproj = (jnp.dot(x_ref[...], w_ih0_ref[...],
                     preferred_element_type=jnp.float32)
             + b_ref[0:1, :])                                    # (T*B, H)

    # Per-layer constants, loaded / broadcast once (outside the unrolled time loop).
    w_hh0 = w_hh0_ref[...]                                       # (H, H)
    w_ihs = [w_ihr_ref[l - 1] for l in range(1, num_layers)]     # each (H, H)
    w_hhs = [w_hhr_ref[l - 1] for l in range(1, num_layers)]     # each (H, H)
    biases = [jnp.broadcast_to(b_ref[l:l + 1, :], (B, H))
              for l in range(1, num_layers)]

    # ---- recurrence, fully unrolled (T and L are trace-time constants). ----
    h = [jnp.zeros((B, H), jnp.float32) for _ in range(num_layers)]
    h_tops = []
    for t in range(T):
        # layer 0: xproj slice is exactly one sublane group (B = 8 rows), aligned.
        h[0] = jnp.tanh(xproj[t * B:(t + 1) * B, :]
                        + jnp.dot(h[0], w_hh0,
                                  preferred_element_type=jnp.float32))
        layer_in = h[0]
        # layers >= 1: two independent K=H dots (no lane-axis concat on the chain).
        for l in range(1, num_layers):
            h[l] = jnp.tanh(jnp.dot(layer_in, w_ihs[l - 1],
                                    preferred_element_type=jnp.float32)
                            + jnp.dot(h[l], w_hhs[l - 1],
                                      preferred_element_type=jnp.float32)
                            + biases[l - 1])
            layer_in = h[l]
        h_tops.append(layer_in)

    # ---- fc head over all timesteps: one batched (T*B, H) @ (H, O) matmul. ----
    hs = jnp.concatenate(h_tops, axis=0)                         # (T*B, H), 8-row pieces
    fc_all = (jnp.dot(hs, w_fc_ref[...], preferred_element_type=jnp.float32)
              + b_fc_ref[...])                                   # (T*B, O)
    fc_ts = [fc_all[t * B:(t + 1) * B, :] for t in range(T)]     # T x (B, O), aligned

    # ---- sequence normalization (min / sum over the time axis), pure VPU. ----
    out_min = fc_ts[0]
    for t in range(1, T):
        out_min = jnp.minimum(out_min, fc_ts[t])
    shifted0 = fc_ts[0] - out_min
    out_sum = shifted0
    for t in range(1, T):
        out_sum = out_sum + (fc_ts[t] - out_min)

    # Only timestep 0 survives the torch forward. Exact divide: one-off epilogue op.
    norm0 = shifted0 / out_sum                                   # (B, O)

    # bins matmul as VPU multiply + lane reduce (avoids an N=1 MXU push/drain).
    y0 = jnp.sum(norm0 * bins_ref[...], axis=-1, keepdims=True)  # (B, 1)
    out_ref[...] = y0


def rnn_net_forward(x, params):
    """x: (B, T, input_dim) float32 (PyTorch batch_first layout). Returns (B, 1, 1)."""
    (w_ih0_t, w_hh0_t, w_ihr_t, w_hhr_t, b_sum, w_fc_t, b_fc, bins_row) = params
    B, T, D_in = x.shape
    num_layers = b_sum.shape[0]

    # Pad the batch to a sublane multiple so all per-step tiles are (8,128)-aligned.
    B_pad = ((B + 7) // 8) * 8
    if B_pad != B:
        x = jnp.pad(x, ((0, B_pad - B), (0, 0), (0, 0)))

    # Time-major, flattened to (T*B_pad, D_in): per-timestep access in the kernel is
    # a static, sublane-group-aligned row slice. (Negligible wrapper op at this size;
    # for long sequences feed (T, B_pad, D) directly and slice x_ref[t] per step.)
    x_flat = jnp.transpose(x, (1, 0, 2)).reshape(T * B_pad, D_in)

    kernel = functools.partial(_rnn_net_kernel,
                               num_layers=num_layers, batch_pad=B_pad)

    vmem = pl.BlockSpec(memory_space=pltpu.MemorySpace.VMEM)
    out = pl.pallas_call(
        kernel,
        out_shape=jax.ShapeDtypeStruct((B_pad, 1), jnp.float32),
        in_specs=[vmem] * 9,
        out_specs=vmem,
        compiler_params=pltpu.CompilerParams(
            # Deterministic footprint; well under the 32 MiB scoped default on every
            # generation (v7x VMEM is 64 MiB total).
            vmem_limit_bytes=32 * 1024 * 1024),
    )(x_flat, w_ih0_t, w_hh0_t, w_ihr_t, w_hhr_t, b_sum, w_fc_t, b_fc, bins_row)

    # Drop pad rows only here, after the kernel.
    return out[:B].reshape(B, -1, 1)                              # (B, 1, 1)


def init_params(key, input_dim, hidden_dim, output_dim, num_layers, tput_step):
    """Deterministic synthetic parameters with PyTorch-like uniform init,
    pre-packed for the kernel (transposed / stacked / bias-summed)."""
    bound = 1.0 / (hidden_dim ** 0.5)
    keys = jax.random.split(key, 4 * num_layers + 2)
    ki = iter(range(len(keys)))

    def u(k, shape):
        return jax.random.uniform(k, shape, jnp.float32, -bound, bound)

    w_ih0 = u(keys[next(ki)], (hidden_dim, input_dim))        # torch: (H, D_in)
    w_ihr = [u(keys[next(ki)], (hidden_dim, hidden_dim))
             for _ in range(num_layers - 1)]                  # layers 1..L-1
    w_hh = [u(keys[next(ki)], (hidden_dim, hidden_dim))
            for _ in range(num_layers)]
    b_ih = u(keys[next(ki)], (num_layers, hidden_dim))
    b_hh = u(keys[next(ki)], (num_layers, hidden_dim))
    w_fc = u(keys[next(ki)], (output_dim, hidden_dim))        # torch Linear: (O, H)
    b_fc = u(keys[next(ki)], (1, output_dim))

    # bins exactly as in the torch __init__
    idx = jnp.arange(output_dim, dtype=jnp.float32)
    bins = tput_step * (2.0 * idx + 1.0) / 2.0
    bins = bins.at[0].set(0.0)
    bins = bins.at[output_dim - 1].set(tput_step * (output_dim - 1))

    # ---- pack for the kernel ----
    w_ih0_t = jnp.transpose(w_ih0)                            # (D_in, H)
    w_hh0_t = jnp.transpose(w_hh[0])                          # (H, H)
    if num_layers > 1:
        w_ihr_t = jnp.stack([jnp.transpose(w_ihr[l - 1])
                             for l in range(1, num_layers)])  # (L-1, H, H)
        w_hhr_t = jnp.stack([jnp.transpose(w_hh[l])
                             for l in range(1, num_layers)])  # (L-1, H, H)
    else:
        # dummies, never indexed by the kernel when num_layers == 1
        w_ihr_t = jnp.zeros((1, hidden_dim, hidden_dim), jnp.float32)
        w_hhr_t = jnp.zeros((1, hidden_dim, hidden_dim), jnp.float32)
    b_sum = b_ih + b_hh                                       # (L, H)  pre-added biases
    w_fc_t = jnp.transpose(w_fc)                              # (H, O)
    bins_row = bins.reshape(1, output_dim)                    # (1, O)

    return (w_ih0_t, w_hh0_t, w_ihr_t, w_hhr_t, b_sum, w_fc_t, b_fc, bins_row)


def _reference_forward(x, params):
    """Pure-jnp reference mirroring the PyTorch forward (eval mode)."""
    (w_ih0_t, w_hh0_t, w_ihr_t, w_hhr_t, b_sum, w_fc_t, b_fc, bins_row) = params
    B, T, _ = x.shape
    L, H = b_sum.shape[0], w_hh0_t.shape[0]
    h = [jnp.zeros((B, H), jnp.float32) for _ in range(L)]
    outs = []
    for t in range(T):
        x_t = x[:, t, :]
        h[0] = jnp.tanh(x_t @ w_ih0_t + h[0] @ w_hh0_t + b_sum[0])
        layer_in = h[0]
        for l in range(1, L):
            h[l] = jnp.tanh(layer_in @ w_ihr_t[l - 1]
                            + h[l] @ w_hhr_t[l - 1]
                            + b_sum[l])
            layer_in = h[l]
        outs.append(layer_in @ w_fc_t + b_fc)
    out = jnp.stack(outs, axis=1)                             # (B, T, O)
    out = out - jnp.min(out, axis=1, keepdims=True)
    out = out / jnp.sum(out, axis=1, keepdims=True)
    out = out @ bins_row.T                                    # (B, T, 1)
    out = out[:, 0, :]
    return out.reshape(out.shape[0], -1, out.shape[-1])


if __name__ == "__main__":
    # Small shapes consistent with the module's forward.
    B, T = 2, 8                  # batch, sequence length (batch_first input)
    input_dim, hidden_dim = 4, 32
    output_dim, num_layers = 8, 2
    tput_step = 1.0

    key = jax.random.PRNGKey(0)
    kx, kp = jax.random.split(key)
    x = jax.random.normal(kx, (B, T, input_dim), dtype=jnp.float32)
    params = init_params(kp, input_dim, hidden_dim, output_dim,
                         num_layers, tput_step)

    y = jax.block_until_ready(rnn_net_forward(x, params))
    y_ref = jax.block_until_ready(_reference_forward(x, params))

    assert y.shape == (B, 1, 1), y.shape
    # Exact divide in the epilogue -> tight tolerance (only f32 MXU accumulation
    # order differences remain).
    assert jnp.allclose(y, y_ref, rtol=1e-4, atol=1e-5), (y, y_ref)

    print("KERNEL_OK")
</pallas_src>

<mosaic_0001>
module attributes {stable_mosaic.version = 11 : i64} {
  func.func @_rnn_net_kernel(%arg0: memref<64x4xf32, #tpu.memory_space<vmem>>, %arg1: memref<4x32xf32, #tpu.memory_space<vmem>>, %arg2: memref<32x32xf32, #tpu.memory_space<vmem>>, %arg3: memref<1x32x32xf32, #tpu.memory_space<vmem>>, %arg4: memref<1x32x32xf32, #tpu.memory_space<vmem>>, %arg5: memref<2x32xf32, #tpu.memory_space<vmem>>, %arg6: memref<32x8xf32, #tpu.memory_space<vmem>>, %arg7: memref<1x8xf32, #tpu.memory_space<vmem>>, %arg8: memref<1x8xf32, #tpu.memory_space<vmem>>, %arg9: memref<8x1xf32, #tpu.memory_space<vmem>>) attributes {dimension_semantics = [], scalar_prefetch = 0 : i64, scratch_operands = 0 : i64, tpu.core_type = #tpu.core_type<tc>} {
    %c0 = arith.constant 0 : index
    %c0_0 = arith.constant 0 : index
    %0 = vector.load %arg0[%c0, %c0_0] : memref<64x4xf32, #tpu.memory_space<vmem>>, vector<64x4xf32>
    %c0_1 = arith.constant 0 : index
    %c0_2 = arith.constant 0 : index
    %1 = vector.load %arg1[%c0_1, %c0_2] : memref<4x32xf32, #tpu.memory_space<vmem>>, vector<4x32xf32>
    %cst = arith.constant dense<0.000000e+00> : vector<64x32xf32>
    %2 = tpu.matmul %0, %1, %cst {dimension_numbers = #tpu.dot_dimension_numbers<[1], [0], [0], [1], [0, 0, 1, 1], [], []>} : vector<64x4xf32>, vector<4x32xf32>, vector<64x32xf32> -> vector<64x32xf32>
    %c0_3 = arith.constant 0 : index
    %c0_4 = arith.constant 0 : index
    %3 = vector.load %arg5[%c0_3, %c0_4] : memref<2x32xf32, #tpu.memory_space<vmem>>, vector<1x32xf32>
    %4 = vector.broadcast %3 : vector<1x32xf32> to vector<64x32xf32>
    %5 = arith.addf %2, %4 : vector<64x32xf32>
    %c0_5 = arith.constant 0 : index
    %c0_6 = arith.constant 0 : index
    %6 = vector.load %arg2[%c0_5, %c0_6] : memref<32x32xf32, #tpu.memory_space<vmem>>, vector<32x32xf32>
    %c0_7 = arith.constant 0 : index
    %c0_8 = arith.constant 0 : index
    %c0_9 = arith.constant 0 : index
    %7 = vector.load %arg3[%c0_7, %c0_8, %c0_9] : memref<1x32x32xf32, #tpu.memory_space<vmem>>, vector<1x32x32xf32>
    %8 = vector.shape_cast %7 : vector<1x32x32xf32> to vector<32x32xf32>
    %c0_10 = arith.constant 0 : index
    %c0_11 = arith.constant 0 : index
    %c0_12 = arith.constant 0 : index
    %9 = vector.load %arg4[%c0_10, %c0_11, %c0_12] : memref<1x32x32xf32, #tpu.memory_space<vmem>>, vector<1x32x32xf32>
    %10 = vector.shape_cast %9 : vector<1x32x32xf32> to vector<32x32xf32>
    %c1 = arith.constant 1 : index
    %c0_13 = arith.constant 0 : index
    %11 = vector.load %arg5[%c1, %c0_13] : memref<2x32xf32, #tpu.memory_space<vmem>>, vector<1x32xf32>
    %12 = vector.shape_cast %11 : vector<1x32xf32> to vector<1x32xf32>
    %13 = vector.broadcast %12 : vector<1x32xf32> to vector<8x32xf32>
    %cst_14 = arith.constant 0.000000e+00 : f32
    %14 = vector.broadcast %cst_14 : f32 to vector<8x32xf32>
    %cst_15 = arith.constant 0.000000e+00 : f32
    %15 = vector.broadcast %cst_15 : f32 to vector<8x32xf32>
    %16 = vector.extract_strided_slice %5 {offsets = [0, 0], sizes = [8, 32], strides = [1, 1]} : vector<64x32xf32> to vector<8x32xf32>
    %cst_16 = arith.constant dense<0.000000e+00> : vector<8x32xf32>
    %17 = tpu.matmul %14, %6, %cst_16 {dimension_numbers = #tpu.dot_dimension_numbers<[1], [0], [0], [1], [0, 0, 1, 1], [], []>} : vector<8x32xf32>, vector<32x32xf32>, vector<8x32xf32> -> vector<8x32xf32>
    %18 = arith.addf %16, %17 : vector<8x32xf32>
    %19 = math.tanh %18 : vector<8x32xf32>
    %cst_17 = arith.constant dense<0.000000e+00> : vector<8x32xf32>
    %20 = tpu.matmul %19, %8, %cst_17 {dimension_numbers = #tpu.dot_dimension_numbers<[1], [0], [0], [1], [0, 0, 1, 1], [], []>} : vector<8x32xf32>, vector<32x32xf32>, vector<8x32xf32> -> vector<8x32xf32>
    %cst_18 = arith.constant dense<0.000000e+00> : vector<8x32xf32>
    %21 = tpu.matmul %15, %10, %cst_18 {dimension_numbers = #tpu.dot_dimension_numbers<[1], [0], [0], [1], [0, 0, 1, 1], [], []>} : vector<8x32xf32>, vector<32x32xf32>, vector<8x32xf32> -> vector<8x32xf32>
    %22 = arith.addf %20, %21 : vector<8x32xf32>
    %23 = arith.addf %22, %13 : vector<8x32xf32>
    %24 = math.tanh %23 : vector<8x32xf32>
    %25 = vector.extract_strided_slice %5 {offsets = [8, 0], sizes = [8, 32], strides = [1, 1]} : vector<64x32xf32> to vector<8x32xf32>
    %cst_19 = arith.constant dense<0.000000e+00> : vector<8x32xf32>
    %26 = tpu.matmul %19, %6, %cst_19 {dimension_numbers = #tpu.dot_dimension_numbers<[1], [0], [0], [1], [0, 0, 1, 1], [], []>} : vector<8x32xf32>, vector<32x32xf32>, vector<8x32xf32> -> vector<8x32xf32>
    %27 = arith.addf %25, %26 : vector<8x32xf32>
    %28 = math.tanh %27 : vector<8x32xf32>
    %cst_20 = arith.constant dense<0.000000e+00> : vector<8x32xf32>
    %29 = tpu.matmul %28, %8, %cst_20 {dimension_numbers = #tpu.dot_dimension_numbers<[1], [0], [0], [1], [0, 0, 1, 1], [], []>} : vector<8x32xf32>, vector<32x32xf32>, vector<8x32xf32> -> vector<8x32xf32>
    %cst_21 = arith.constant dense<0.000000e+00> : vector<8x32xf32>
    %30 = tpu.matmul %24, %10, %cst_21 {dimension_numbers = #tpu.dot_dimension_numbers<[1], [0], [0], [1], [0, 0, 1, 1], [], []>} : vector<8x32xf32>, vector<32x32xf32>, vector<8x32xf32> -> vector<8x32xf32>
    %31 = arith.addf %29, %30 : vector<8x32xf32>
    %32 = arith.addf %31, %13 : vector<8x32xf32>
    %33 = math.tanh %32 : vector<8x32xf32>
    %34 = vector.extract_strided_slice %5 {offsets = [16, 0], sizes = [8, 32], strides = [1, 1]} : vector<64x32xf32> to vector<8x32xf32>
    %cst_22 = arith.constant dense<0.000000e+00> : vector<8x32xf32>
    %35 = tpu.matmul %28, %6, %cst_22 {dimension_numbers = #tpu.dot_dimension_numbers<[1], [0], [0], [1], [0, 0, 1, 1], [], []>} : vector<8x32xf32>, vector<32x32xf32>, vector<8x32xf32> -> vector<8x32xf32>
    %36 = arith.addf %34, %35 : vector<8x32xf32>
    %37 = math.tanh %36 : vector<8x32xf32>
    %cst_23 = arith.constant dense<0.000000e+00> : vector<8x32xf32>
    %38 = tpu.matmul %37, %8, %cst_23 {dimension_numbers = #tpu.dot_dimension_numbers<[1], [0], [0], [1], [0, 0, 1, 1], [], []>} : vector<8x32xf32>, vector<32x32xf32>, vector<8x32xf32> -> vector<8x32xf32>
    %cst_24 = arith.constant dense<0.000000e+00> : vector<8x32xf32>
    %39 = tpu.matmul %33, %10, %cst_24 {dimension_numbers = #tpu.dot_dimension_numbers<[1], [0], [0], [1], [0, 0, 1, 1], [], []>} : vector<8x32xf32>, vector<32x32xf32>, vector<8x32xf32> -> vector<8x32xf32>
    %40 = arith.addf %38, %39 : vector<8x32xf32>
    %41 = arith.addf %40, %13 : vector<8x32xf32>
    %42 = math.tanh %41 : vector<8x32xf32>
    %43 = vector.extract_strided_slice %5 {offsets = [24, 0], sizes = [8, 32], strides = [1, 1]} : vector<64x32xf32> to vector<8x32xf32>
    %cst_25 = arith.constant dense<0.000000e+00> : vector<8x32xf32>
    %44 = tpu.matmul %37, %6, %cst_25 {dimension_numbers = #tpu.dot_dimension_numbers<[1], [0], [0], [1], [0, 0, 1, 1], [], []>} : vector<8x32xf32>, vector<32x32xf32>, vector<8x32xf32> -> vector<8x32xf32>
    %45 = arith.addf %43, %44 : vector<8x32xf32>
    %46 = math.tanh %45 : vector<8x32xf32>
    %cst_26 = arith.constant dense<0.000000e+00> : vector<8x32xf32>
    %47 = tpu.matmul %46, %8, %cst_26 {dimension_numbers = #tpu.dot_dimension_numbers<[1], [0], [0], [1], [0, 0, 1, 1], [], []>} : vector<8x32xf32>, vector<32x32xf32>, vector<8x32xf32> -> vector<8x32xf32>
    %cst_27 = arith.constant dense<0.000000e+00> : vector<8x32xf32>
    %48 = tpu.matmul %42, %10, %cst_27 {dimension_numbers = #tpu.dot_dimension_numbers<[1], [0], [0], [1], [0, 0, 1, 1], [], []>} : vector<8x32xf32>, vector<32x32xf32>, vector<8x32xf32> -> vector<8x32xf32>
    %49 = arith.addf %47, %48 : vector<8x32xf32>
    %50 = arith.addf %49, %13 : vector<8x32xf32>
    %51 = math.tanh %50 : vector<8x32xf32>
    %52 = vector.extract_strided_slice %5 {offsets = [32, 0], sizes = [8, 32], strides = [1, 1]} : vector<64x32xf32> to vector<8x32xf32>
    %cst_28 = arith.constant dense<0.000000e+00> : vector<8x32xf32>
    %53 = tpu.matmul %46, %6, %cst_28 {dimension_numbers = #tpu.dot_dimension_numbers<[1], [0], [0], [1], [0, 0, 1, 1], [], []>} : vector<8x32xf32>, vector<32x32xf32>, vector<8x32xf32> -> vector<8x32xf32>
    %54 = arith.addf %52, %53 : vector<8x32xf32>
    %55 = math.tanh %54 : vector<8x32xf32>
    %cst_29 = arith.constant dense<0.000000e+00> : vector<8x32xf32>
    %56 = tpu.matmul %55, %8, %cst_29 {dimension_numbers = #tpu.dot_dimension_numbers<[1], [0], [0], [1], [0, 0, 1, 1], [], []>} : vector<8x32xf32>, vector<32x32xf32>, vector<8x32xf32> -> vector<8x32xf32>
    %cst_30 = arith.constant dense<0.000000e+00> : vector<8x32xf32>
    %57 = tpu.matmul %51, %10, %cst_30 {dimension_numbers = #tpu.dot_dimension_numbers<[1], [0], [0], [1], [0, 0, 1, 1], [], []>} : vector<8x32xf32>, vector<32x32xf32>, vector<8x32xf32> -> vector<8x32xf32>
    %58 = arith.addf %56, %57 : vector<8x32xf32>
    %59 = arith.addf %58, %13 : vector<8x32xf32>
    %60 = math.tanh %59 : vector<8x32xf32>
    %61 = vector.extract_strided_slice %5 {offsets = [40, 0], sizes = [8, 32], strides = [1, 1]} : vector<64x32xf32> to vector<8x32xf32>
    %cst_31 = arith.constant dense<0.000000e+00> : vector<8x32xf32>
    %62 = tpu.matmul %55, %6, %cst_31 {dimension_numbers = #tpu.dot_dimension_numbers<[1], [0], [0], [1], [0, 0, 1, 1], [], []>} : vector<8x32xf32>, vector<32x32xf32>, vector<8x32xf32> -> vector<8x32xf32>
    %63 = arith.addf %61, %62 : vector<8x32xf32>
    %64 = math.tanh %63 : vector<8x32xf32>
    %cst_32 = arith.constant dense<0.000000e+00> : vector<8x32xf32>
    %65 = tpu.matmul %64, %8, %cst_32 {dimension_numbers = #tpu.dot_dimension_numbers<[1], [0], [0], [1], [0, 0, 1, 1], [], []>} : vector<8x32xf32>, vector<32x32xf32>, vector<8x32xf32> -> vector<8x32xf32>
    %cst_33 = arith.constant dense<0.000000e+00> : vector<8x32xf32>
    %66 = tpu.matmul %60, %10, %cst_33 {dimension_numbers = #tpu.dot_dimension_numbers<[1], [0], [0], [1], [0, 0, 1, 1], [], []>} : vector<8x32xf32>, vector<32x32xf32>, vector<8x32xf32> -> vector<8x32xf32>
    %67 = arith.addf %65, %66 : vector<8x32xf32>
    %68 = arith.addf %67, %13 : vector<8x32xf32>
    %69 = math.tanh %68 : vector<8x32xf32>
    %70 = vector.extract_strided_slice %5 {offsets = [48, 0], sizes = [8, 32], strides = [1, 1]} : vector<64x32xf32> to vector<8x32xf32>
    %cst_34 = arith.constant dense<0.000000e+00> : vector<8x32xf32>
    %71 = tpu.matmul %64, %6, %cst_34 {dimension_numbers = #tpu.dot_dimension_numbers<[1], [0], [0], [1], [0, 0, 1, 1], [], []>} : vector<8x32xf32>, vector<32x32xf32>, vector<8x32xf32> -> vector<8x32xf32>
    %72 = arith.addf %70, %71 : vector<8x32xf32>
    %73 = math.tanh %72 : vector<8x32xf32>
    %cst_35 = arith.constant dense<0.000000e+00> : vector<8x32xf32>
    %74 = tpu.matmul %73, %8, %cst_35 {dimension_numbers = #tpu.dot_dimension_numbers<[1], [0], [0], [1], [0, 0, 1, 1], [], []>} : vector<8x32xf32>, vector<32x32xf32>, vector<8x32xf32> -> vector<8x32xf32>
    %cst_36 = arith.constant dense<0.000000e+00> : vector<8x32xf32>
    %75 = tpu.matmul %69, %10, %cst_36 {dimension_numbers = #tpu.dot_dimension_numbers<[1], [0], [0], [1], [0, 0, 1, 1], [], []>} : vector<8x32xf32>, vector<32x32xf32>, vector<8x32xf32> -> vector<8x32xf32>
    %76 = arith.addf %74, %75 : vector<8x32xf32>
    %77 = arith.addf %76, %13 : vector<8x32xf32>
    %78 = math.tanh %77 : vector<8x32xf32>
    %79 = vector.extract_strided_slice %5 {offsets = [56, 0], sizes = [8, 32], strides = [1, 1]} : vector<64x32xf32> to vector<8x32xf32>
    %cst_37 = arith.constant dense<0.000000e+00> : vector<8x32xf32>
    %80 = tpu.matmul %73, %6, %cst_37 {dimension_numbers = #tpu.dot_dimension_numbers<[1], [0], [0], [1], [0, 0, 1, 1], [], []>} : vector<8x32xf32>, vector<32x32xf32>, vector<8x32xf32> -> vector<8x32xf32>
    %81 = arith.addf %79, %80 : vector<8x32xf32>
    %82 = math.tanh %81 : vector<8x32xf32>
    %cst_38 = arith.constant dense<0.000000e+00> : vector<8x32xf32>
    %83 = tpu.matmul %82, %8, %cst_38 {dimension_numbers = #tpu.dot_dimension_numbers<[1], [0], [0], [1], [0, 0, 1, 1], [], []>} : vector<8x32xf32>, vector<32x32xf32>, vector<8x32xf32> -> vector<8x32xf32>
    %cst_39 = arith.constant dense<0.000000e+00> : vector<8x32xf32>
    %84 = tpu.matmul %78, %10, %cst_39 {dimension_numbers = #tpu.dot_dimension_numbers<[1], [0], [0], [1], [0, 0, 1, 1], [], []>} : vector<8x32xf32>, vector<32x32xf32>, vector<8x32xf32> -> vector<8x32xf32>
    %85 = arith.addf %83, %84 : vector<8x32xf32>
    %86 = arith.addf %85, %13 : vector<8x32xf32>
    %87 = math.tanh %86 : vector<8x32xf32>
    %88 = tpu.concatenate %24, %33, %42, %51, %60, %69, %78, %87 in 0 : vector<8x32xf32>, vector<8x32xf32>, vector<8x32xf32>, vector<8x32xf32>, vector<8x32xf32>, vector<8x32xf32>, vector<8x32xf32>, vector<8x32xf32> -> vector<64x32xf32>
    %c0_40 = arith.constant 0 : index
    %c0_41 = arith.constant 0 : index
    %89 = vector.load %arg6[%c0_40, %c0_41] : memref<32x8xf32, #tpu.memory_space<vmem>>, vector<32x8xf32>
    %cst_42 = arith.constant dense<0.000000e+00> : vector<64x8xf32>
    %90 = tpu.matmul %88, %89, %cst_42 {dimension_numbers = #tpu.dot_dimension_numbers<[1], [0], [0], [1], [0, 0, 1, 1], [], []>} : vector<64x32xf32>, vector<32x8xf32>, vector<64x8xf32> -> vector<64x8xf32>
    %c0_43 = arith.constant 0 : index
    %c0_44 = arith.constant 0 : index
    %91 = vector.load %arg7[%c0_43, %c0_44] : memref<1x8xf32, #tpu.memory_space<vmem>>, vector<1x8xf32>
    %92 = vector.broadcast %91 : vector<1x8xf32> to vector<64x8xf32>
    %93 = arith.addf %90, %92 : vector<64x8xf32>
    %94 = vector.extract_strided_slice %93 {offsets = [0, 0], sizes = [8, 8], strides = [1, 1]} : vector<64x8xf32> to vector<8x8xf32>
    %95 = vector.extract_strided_slice %93 {offsets = [8, 0], sizes = [8, 8], strides = [1, 1]} : vector<64x8xf32> to vector<8x8xf32>
    %96 = vector.extract_strided_slice %93 {offsets = [16, 0], sizes = [8, 8], strides = [1, 1]} : vector<64x8xf32> to vector<8x8xf32>
    %97 = vector.extract_strided_slice %93 {offsets = [24, 0], sizes = [8, 8], strides = [1, 1]} : vector<64x8xf32> to vector<8x8xf32>
    %98 = vector.extract_strided_slice %93 {offsets = [32, 0], sizes = [8, 8], strides = [1, 1]} : vector<64x8xf32> to vector<8x8xf32>
    %99 = vector.extract_strided_slice %93 {offsets = [40, 0], sizes = [8, 8], strides = [1, 1]} : vector<64x8xf32> to vector<8x8xf32>
    %100 = vector.extract_strided_slice %93 {offsets = [48, 0], sizes = [8, 8], strides = [1, 1]} : vector<64x8xf32> to vector<8x8xf32>
    %101 = vector.extract_strided_slice %93 {offsets = [56, 0], sizes = [8, 8], strides = [1, 1]} : vector<64x8xf32> to vector<8x8xf32>
    %102 = arith.minimumf %94, %95 : vector<8x8xf32>
    %103 = arith.minimumf %102, %96 : vector<8x8xf32>
    %104 = arith.minimumf %103, %97 : vector<8x8xf32>
    %105 = arith.minimumf %104, %98 : vector<8x8xf32>
    %106 = arith.minimumf %105, %99 : vector<8x8xf32>
    %107 = arith.minimumf %106, %100 : vector<8x8xf32>
    %108 = arith.minimumf %107, %101 : vector<8x8xf32>
    %109 = arith.subf %94, %108 : vector<8x8xf32>
    %110 = arith.subf %95, %108 : vector<8x8xf32>
    %111 = arith.addf %109, %110 : vector<8x8xf32>
    %112 = arith.subf %96, %108 : vector<8x8xf32>
    %113 = arith.addf %111, %112 : vector<8x8xf32>
    %114 = arith.subf %97, %108 : vector<8x8xf32>
    %115 = arith.addf %113, %114 : vector<8x8xf32>
    %116 = arith.subf %98, %108 : vector<8x8xf32>
    %117 = arith.addf %115, %116 : vector<8x8xf32>
    %118 = arith.subf %99, %108 : vector<8x8xf32>
    %119 = arith.addf %117, %118 : vector<8x8xf32>
    %120 = arith.subf %100, %108 : vector<8x8xf32>
    %121 = arith.addf %119, %120 : vector<8x8xf32>
    %122 = arith.subf %101, %108 : vector<8x8xf32>
    %123 = arith.addf %121, %122 : vector<8x8xf32>
    %124 = arith.divf %109, %123 : vector<8x8xf32>
    %c0_45 = arith.constant 0 : index
    %c0_46 = arith.constant 0 : index
    %125 = vector.load %arg8[%c0_45, %c0_46] : memref<1x8xf32, #tpu.memory_space<vmem>>, vector<1x8xf32>
    %126 = vector.broadcast %125 : vector<1x8xf32> to vector<8x8xf32>
    %127 = arith.mulf %124, %126 : vector<8x8xf32>
    %cst_47 = arith.constant dense<0.000000e+00> : vector<8xf32>
    %128 = vector.multi_reduction <add>, %127, %cst_47 [1] : vector<8x8xf32> to vector<8xf32>
    %129 = vector.shape_cast %128 : vector<8xf32> to vector<8x1xf32>
    %c0_48 = arith.constant 0 : index
    %c0_49 = arith.constant 0 : index
    %130 = vector.load %arg9[%c0_48, %c0_49] : memref<8x1xf32, #tpu.memory_space<vmem>>, vector<8x1xf32>
    tpu.vector_store %arg9[%c0_48, %c0_49], %129 {strides = array<i32>} : memref<8x1xf32, #tpu.memory_space<vmem>>, vector<8x1xf32>,
    return
  }
}

</mosaic_0001>

<bundles_post_ra>
// kernel: tpu_custom_call.1
= control target key start
LH: loop header
LB: loop body
LE: loop exit
PB: predicated region body
PF: predicated region fallthrough
CT: control target
= control target key end

     0   :  { %vm71_vm0 = vcmask 1043456   ;;  %vm46_vm1 = vcmask 31744   ;;  %v2792_v8 = vmov 0.0|0.0   ;;  %vm2793_vm2 = vmmov 0   ;;  %s3190_s1 = inlined_call_operand.vmem [shape: f32[4,32], index: 1, kind: input, shape index: {}]   ;;  %s3191_s0 = inlined_call_operand.vmem [shape: f32[64,4], index: 0, kind: input, shape index: {}]   ;;  %s3192_s2 = inlined_call_operand.vmem [shape: f32[32,32], index: 2, kind: input, shape index: {}]   ;;  %s3193_s4 = inlined_call_operand.vmem [shape: f32[1,32,32], index: 4, kind: input, shape index: {}]   ;;  %s3194_s3 = inlined_call_operand.vmem [shape: f32[1,32,32], index: 3, kind: input, shape index: {}]   ;;  %s3195_s5 = inlined_call_operand.vmem [shape: f32[2,32], index: 5, kind: input, shape index: {}]   ;;  %s3196_s6 = inlined_call_operand.vmem [shape: f32[32,8], index: 6, kind: input, shape index: {}]   ;;  %s3197_s7 = inlined_call_operand.vmem [shape: f32[1,8], index: 7, kind: input, shape index: {}]   ;;  %s3198_s8 = inlined_call_operand.vmem [shape: f32[1,8], index: 8, kind: input, shape index: {}]   ;;  %s3199_s9 = inlined_call_operand.vmem [shape: f32[8,1], index: 9, kind: output, shape index: {}]  }
   0x1   :  { %v40_v0 = vld [vmem:[%s3190_s1] sm:$0xf]  ;;  %v37_v2 = vld [vmem:[%s3191_s0 + $0x28] sm:$0xff]  ;;  %v38_v5 = vld [vmem:[%s3191_s0 + $0x30] sm:$0xff]  ;;  %v2794_v14 = vmov 0.0   ;;  %vm197_vm3 = vcmask 261120  }
   0x2   :  { %v36_v1 = vld [vmem:[%s3191_s0 + $0x20] sm:$0xff]  ;;  %2753 = vmatprep.subr.msk.mxu1 %vm71_vm0, %v40_v0  ;;  %v181_v4 = vld [vmem:[%s3192_s2 + $0x8] sm:$0xff]  ;;  %2303 = vmatprep.subr.msk.mxu0 %vm71_vm0, %v40_v0  ;;  %v182_v10 = vld [vmem:[%s3192_s2 + $0x10] sm:$0xff]  ;;  %vm2109_vm4 = vcmask 64512   ;;  %vm2113_vm5 = vcmask 7168  }
   0x3   :  { %2311 = vmatprep.mubr.msk.f32.mxu1 %vm46_vm1, %v36_v1  ;;  %v180_v3 = vld [vmem:[%s3192_s2] sm:$0xff]  ;;  %2754 = vmatpush3.msk.msra.mxu1 %vm71_vm0, %v40_v0  ;;  %v33_v9 = vld [vmem:[%s3191_s0 + $0x8] sm:$0xff]  ;;  %v183_v11 = vld [vmem:[%s3192_s2 + $0x18] sm:$0xff] }
   0x4   :  { %v2866_v6 = vpack.c.bf16 %v181_v4, %v180_v3  ;;  %v32_v7 = vld [vmem:[%s3191_s0] sm:$0xff]  ;;  %2312 = vmatmul.mubr.msk.f32.vlgmr.msra.gmra.mrb[0].mxu1 %vm46_vm1, %v37_v2  ;;  %2601 = vmatprep.subr.bf16.mxu1 %v2792_v8  ;;  %v39_v12 = vld [vmem:[%s3191_s0 + $0x38] sm:$0xff]  ;;  %v2888_v13 = vpack.c.bf16 %v183_v11, %v182_v10  ;;  %v189_v16 = vld [vmem:[%s3193_s4 + $0x8] sm:$0xff] }
   0x5   :  { %2314 = vmatprep.mubr.msk.f32.mxu1 %vm46_vm1, %v38_v5  ;;  %2304 = vmatpush3.msk.msra.mxu0 %vm71_vm0, %v40_v0  ;;  %v188_v15 = vld [vmem:[%s3193_s4] sm:$0xff]  ;;  %v190_v18 = vld [vmem:[%s3193_s4 + $0x10] sm:$0xff]  ;;  %v191_v19 = vld [vmem:[%s3193_s4 + $0x18] sm:$0xff] }
   0x6   :  { %2603 = vmatpush3.bf16.msra.mxu1 %v2866_v6  ;;  %2305 = vmatprep.mubr.msk.f32.mxu0 %vm46_vm1, %v32_v7  ;;  %v2909_v17 = vpack.c.bf16 %v189_v16, %v188_v15  ;;  %v2919_v20 = vpack.c.bf16 %v191_v19, %v190_v18  ;;  %v34_v21 = vld [vmem:[%s3191_s0 + $0x10] sm:$0xff]  ;;  %v35_v22 = vld [vmem:[%s3191_s0 + $0x18] sm:$0xff]  ;;  %v184_v23 = vld [vmem:[%s3194_s3] sm:$0xff] }
   0x7   :  { %2604 = vmatprep.subr.bf16.mxu1 %v2792_v8  ;;  %2306 = vmatmul.mubr.msk.f32.vlgmr.msra.gmra.mrb[0].mxu0 %vm46_vm1, %v33_v9  ;;  %v185_v24 = vld [vmem:[%s3194_s3 + $0x8] sm:$0xff]  ;;  %v186_v25 = vld [vmem:[%s3194_s3 + $0x10] sm:$0xff]  ;;  %v187_v27 = vld [vmem:[%s3194_s3 + $0x18] sm:$0xff] }
   0x8   :  { %2315 = vmatmul.mubr.msk.f32.gmra.mrb[2].mxu1 %vm46_vm1, %v39_v12  ;;  %2613 = vmatprep.subr.bf16.mxu0 %v2792_v8  ;;  %v2939_v26 = vpack.c.bf16 %v185_v24, %v184_v23  ;;  %v2950_v28 = vpack.c.bf16 %v187_v27, %v186_v25  ;;  %v2967_v32 = vld [vmem:[%s3195_s5] ss:$0 sm:$0xff]  ;;  %v2994_v46 = vld [vmem:[%s3195_s5 + $0x1] ss:$0 sm:$0xff] }
   0x9   :  { %2325 = vmatprep.mubr.msk.f32.mxu1 %vm2793_vm2, %v2794_v14  ;;  %2308 = vmatprep.mubr.msk.f32.mxu0 %vm46_vm1, %v34_v21 }
   0xa   :  { %2606 = vmatpush3.bf16.msra.mxu1 %v2888_v13  ;;  %2615 = vmatpush3.bf16.msra.mxu0 %v2939_v26 }
   0xb   :  { %2607 = vmatprep.subr.bf16.mxu1 %v2792_v8  ;;  %2309 = vmatmul.mubr.msk.f32.gmra.mrb[2].mxu0 %vm46_vm1, %v35_v22 }
   0xc   :  { %2347 = vmatprep.mubr.msk.f32.mxu0 %vm2793_vm2, %v2794_v14  ;;  %2616 = vmatprep.subr.bf16.mxu0 %v2792_v8 }
   0xd   :  { %2326 = vmatmul.mubr.f32.vlgmr.msra.gmra.mrb[4].mxu1 %v2794_v14 }
   0xe   :  { %2336 = vmatprep.mubr.msk.f32.mxu1 %vm2793_vm2, %v2794_v14  ;;  %2609 = vmatpush3.bf16.msra.mxu1 %v2909_v17 }
   0xf   :  { %2610 = vmatprep.subr.bf16.mxu1 %v2792_v8  ;;  %2618 = vmatpush3.bf16.msra.mxu0 %v2950_v28 }
  0x10   :  { %2625 = vmatprep.subr.bf16.mxu0 %v2792_v8 }
  0x12   :  { %2612 = vmatpush3.bf16.msra.mxu1 %v2919_v20 }
  0x13   :  { %2619 = vmatprep.subr.bf16.mxu1 %v2792_v8 }
  0x15   :  { %2337 = vmatmul.mubr.f32.vlgmr.msra.gmra.mrb[6].mxu1 %v2794_v14 }
  0x16   :  { %2621 = vmatpush3.bf16.msra.mxu1 %v2866_v6  ;;  %2358 = vmatprep.mubr.msk.f32.mxu1 %vm2793_vm2, %v2794_v14 }
  0x17   :  { %2622 = vmatprep.subr.bf16.mxu1 %v2792_v8 }
  0x1a   :  { %2624 = vmatpush3.bf16.msra.mxu1 %v2888_v13 }
  0x1b   :  { %2631 = vmatprep.subr.bf16.mxu1 %v2792_v8 }
  0xd7   :  { %v2960_v29 = vpop.f32.mrb[0].mxu1 }
  0xd8   :  { %v2962_v30 = vpop.f32.mrb[1].mxu1 }
  0xda   :  { %v2307_v31 = vpop.f32.mrb[0].mxu0 }
  0xdb   :  { %v2969_v33 = vpop.f32.mrb[2].mxu1  ;;  %v141_v34 = vpop.f32.mrb[1].mxu0  ;;  %v147_v45 = vadd.f32 %v2307_v31, %v2967_v32 }
  0xdc   :  { %v2971_v35 = vpop.f32.mrb[3].mxu1  ;;  %v142_v36 = vadd.f32 %v2967_v32, %v141_v34  ;;  %v162_v34 = vadd.f32 %v2967_v32, %v2962_v30 }
  0xde   :  { %v2988_v41 = vpop.f32.mrb[2].mxu0 }
  0xdf   :  { %v151_v43 = vpop.f32.mrb[3].mxu0  ;;  %v157_v9 = vadd.f32 %v2988_v41, %v2967_v32 }
  0xe0   :  { %v267_v37 = vpop.f32.mrb[4].mxu1  ;;  %v152_v62 = vadd.f32 %v2967_v32, %v151_v43 }
  0xe1   :  { %v271_v38 = vadd.f32 %v267_v37, %v142_v36  ;;  %v2327_v39 = vpop.f32.mrb[5].mxu1 }
  0xe3   :  { %2758 = vtanh.f32 %v271_v38 }
  0xe8   :  { %v339_v42 = vpop.f32.mrb[6].mxu1 }
  0xe9   :  { %v2338_v44 = vpop.f32.mrb[7].mxu1 }
  0xed   :  { %v2759_v40 = vpop.eup %2758 }
  0xee   :  { %2348 = vmatmul.mubr.msk.f32.vlgmr.msra.gmra.mrb[4].mxu0 %vm197_vm3, %v2759_v40  ;;  %2359 = vmatmul.mubr.msk.f32.vlgmr.msra.gmra.mrb[8].mxu1 %vm197_vm3, %v2759_v40 }
  0xef   :  { %2633 = vmatpush3.bf16.msra.mxu1 %v2939_v26  ;;  %2627 = vmatpush3.bf16.msra.mxu0 %v2909_v17 }
  0xf0   :  { %2634 = vmatprep.subr.bf16.mxu1 %v2792_v8  ;;  %2628 = vmatprep.subr.bf16.mxu0 %v2792_v8 }
  0xf1   :  { %2380 = vmatprep.mubr.msk.f32.mxu1 %vm2793_vm2, %v2794_v14  ;;  %2369 = vmatprep.mubr.msk.f32.mxu0 %vm2793_vm2, %v2794_v14 }
  0xf3   :  { %2636 = vmatpush3.bf16.msra.mxu1 %v2950_v28  ;;  %2630 = vmatpush3.bf16.msra.mxu0 %v2919_v20 }
  0xf4   :  { %2637 = vmatprep.subr.bf16.mxu0 %v2792_v8  ;;  %2643 = vmatprep.subr.bf16.mxu1 %v2792_v8 }
 0x1c1   :  { %v412_v47 = vpop.f32.mrb[4].mxu0  ;;  %v484_v48 = vpop.f32.mrb[8].mxu1 }
 0x1c2   :  { %v413_v49 = vadd.f32 %v412_v47, %v339_v42  ;;  %v488_v50 = vadd.f32 %v484_v48, %v147_v45  ;;  %v2349_v51 = vpop.f32.mrb[5].mxu0  ;;  %v2360_v52 = vpop.f32.mrb[9].mxu1  ;;  %v167_v45 = vadd.f32 %v2960_v29, %v2967_v32 }
 0x1c4   :  { %v416_v53 = vadd.f32 %v2994_v46, %v413_v49  ;;  %2760 = vtanh.f32 %v488_v50 }
 0x1c6   :  { %2762 = vtanh.f32 %v416_v53 }
 0x1ce   :  { %v2761_v54 = vpop.eup %2760 }
 0x1cf   :  { %2381 = vmatmul.mubr.msk.f32.vlgmr.msra.gmra.mrb[10].mxu1 %vm197_vm3, %v2761_v54 }
 0x1d0   :  { %v2998_v55 = vpop.eup %2762  ;;  %2645 = vmatpush3.bf16.msra.mxu1 %v2909_v17  ;;  %2402 = vmatprep.mubr.msk.f32.mxu1 %vm2793_vm2, %v2794_v14 }
 0x1d1   :  { %2370 = vmatmul.mubr.msk.f32.vlgmr.msra.gmra.mrb[6].mxu0 %vm197_vm3, %v2998_v55  ;;  %2646 = vmatprep.subr.bf16.mxu1 %v2792_v8 }
 0x1d2   :  { %2639 = vmatpush3.bf16.msra.mxu0 %v2866_v6  ;;  %2391 = vmatprep.mubr.msk.f32.mxu0 %vm2793_vm2, %v2794_v14 }
 0x1d3   :  { %2640 = vmatprep.subr.bf16.mxu0 %v2792_v8 }
 0x1d4   :  { %2648 = vmatpush3.bf16.msra.mxu1 %v2919_v20 }
 0x1d5   :  { %2655 = vmatprep.subr.bf16.mxu1 %v2792_v8 }
 0x1d6   :  { %2642 = vmatpush3.bf16.msra.mxu0 %v2888_v13 }
 0x1d7   :  { %2649 = vmatprep.subr.bf16.mxu0 %v2792_v8 }
 0x1d9   :  { %2392 = vmatmul.mubr.msk.f32.vlgmr.msra.gmra.mrb[8].mxu0 %vm197_vm3, %v2761_v54 }
 0x1da   :  { %2651 = vmatpush3.bf16.msra.mxu0 %v2939_v26  ;;  %2413 = vmatprep.mubr.msk.f32.mxu0 %vm2793_vm2, %v2794_v14 }
 0x1db   :  { %2652 = vmatprep.subr.bf16.mxu0 %v2792_v8 }
 0x1de   :  { %2654 = vmatpush3.bf16.msra.mxu0 %v2950_v28 }
 0x1df   :  { %2661 = vmatprep.subr.bf16.mxu0 %v2792_v8 }
 0x2a2   :  { %v632_v56 = vpop.f32.mrb[10].mxu1 }
 0x2a3   :  { %v2382_v57 = vpop.f32.mrb[11].mxu1 }
 0x2a4   :  { %v559_v58 = vpop.f32.mrb[6].mxu0 }
 0x2a5   :  { %v633_v59 = vadd.f32 %v632_v56, %v559_v58  ;;  %v2371_v60 = vpop.f32.mrb[7].mxu0 }
 0x2a7   :  { %v636_v61 = vadd.f32 %v2994_v46, %v633_v59  ;;  %v172_v59 = vadd.f32 %v2967_v32, %v2971_v35 }
 0x2a9   :  { %2764 = vtanh.f32 %v636_v61 }
 0x2ac   :  { %v704_v63 = vpop.f32.mrb[8].mxu0 }
 0x2ad   :  { %v708_v0 = vadd.f32 %v704_v63, %v152_v62  ;;  %v2393_v1 = vpop.f32.mrb[9].mxu0 }
 0x2af   :  { %2766 = vtanh.f32 %v708_v0 }
 0x2b3   :  { %v3023_v2 = vpop.eup %2764 }
 0x2b4   :  { %2403 = vmatmul.mubr.msk.f32.vlgmr.msra.gmra.mrb[12].mxu1 %vm197_vm3, %v3023_v2 }
 0x2b5   :  { %2657 = vmatpush3.bf16.msra.mxu1 %v2866_v6  ;;  %2424 = vmatprep.mubr.msk.f32.mxu1 %vm2793_vm2, %v2794_v14 }
 0x2b6   :  { %2658 = vmatprep.subr.bf16.mxu1 %v2792_v8 }
 0x2b9   :  { %v2767_v3 = vpop.eup %2766  ;;  %2660 = vmatpush3.bf16.msra.mxu1 %v2888_v13 }
 0x2ba   :  { %2414 = vmatmul.mubr.msk.f32.vlgmr.msra.gmra.mrb[10].mxu0 %vm197_vm3, %v2767_v3  ;;  %2667 = vmatprep.subr.bf16.mxu1 %v2792_v8 }
 0x2bb   :  { %2663 = vmatpush3.bf16.msra.mxu0 %v2909_v17  ;;  %2435 = vmatprep.mubr.msk.f32.mxu0 %vm2793_vm2, %v2794_v14 }
 0x2bc   :  { %2425 = vmatmul.mubr.msk.f32.vlgmr.msra.gmra.mrb[14].mxu1 %vm197_vm3, %v2767_v3  ;;  %2664 = vmatprep.subr.bf16.mxu0 %v2792_v8 }
 0x2bd   :  { %2669 = vmatpush3.bf16.msra.mxu1 %v2939_v26  ;;  %2446 = vmatprep.mubr.msk.f32.mxu1 %vm2793_vm2, %v2794_v14 }
 0x2be   :  { %2670 = vmatprep.subr.bf16.mxu1 %v2792_v8 }
 0x2bf   :  { %2666 = vmatpush3.bf16.msra.mxu0 %v2919_v20 }
 0x2c0   :  { %2673 = vmatprep.subr.bf16.mxu0 %v2792_v8 }
 0x2c1   :  { %2672 = vmatpush3.bf16.msra.mxu1 %v2950_v28 }
 0x2c2   :  { %2679 = vmatprep.subr.bf16.mxu1 %v2792_v8 }
 0x387   :  { %v779_v4 = vpop.f32.mrb[12].mxu1 }
 0x388   :  { %v2404_v5 = vpop.f32.mrb[13].mxu1 }
 0x38d   :  { %v852_v7 = vpop.f32.mrb[10].mxu0 }
 0x38e   :  { %v853_v10 = vadd.f32 %v852_v7, %v779_v4  ;;  %v2415_v11 = vpop.f32.mrb[11].mxu0  ;;  %v1960_v7 = vld [vmem:[%s3196_s6 + $0x10] sm:$0xff] }
 0x38f   :  { %v924_v12 = vpop.f32.mrb[14].mxu1 }
 0x390   :  { %v856_v15 = vadd.f32 %v2994_v46, %v853_v10  ;;  %v928_v16 = vadd.f32 %v924_v12, %v157_v9  ;;  %v2426_v18 = vpop.f32.mrb[15].mxu1  ;;  %v1961_v9 = vld [vmem:[%s3196_s6 + $0x18] sm:$0xff] }
 0x391   :  { %v2749_v10 = vpack.c.bf16 %v1961_v9, %v1960_v7  ;;  %v2152_v18 = vld [vmem:[%s3197_s7] ss:$0 sm:$0xff] }
 0x392   :  { %2768 = vtanh.f32 %v856_v15 }
 0x393   :  { %2770 = vtanh.f32 %v928_v16 }
 0x39c   :  { %v3050_v19 = vpop.eup %2768 }
 0x39d   :  { %v2771_v21 = vpop.eup %2770  ;;  %2436 = vmatmul.mubr.msk.f32.vlgmr.msra.gmra.mrb[12].mxu0 %vm197_vm3, %v3050_v19 }
 0x39e   :  { %2447 = vmatmul.mubr.msk.f32.vlgmr.msra.gmra.mrb[16].mxu1 %vm197_vm3, %v2771_v21  ;;  %2675 = vmatpush3.bf16.msra.mxu0 %v2866_v6 }
 0x39f   :  { %2676 = vmatprep.subr.bf16.mxu0 %v2792_v8  ;;  %2457 = vmatprep.mubr.msk.f32.mxu0 %vm2793_vm2, %v2794_v14 }
 0x3a0   :  { %2681 = vmatpush3.bf16.msra.mxu1 %v2909_v17  ;;  %2468 = vmatprep.mubr.msk.f32.mxu1 %vm2793_vm2, %v2794_v14 }
 0x3a1   :  { %2682 = vmatprep.subr.bf16.mxu1 %v2792_v8 }
 0x3a2   :  { %2678 = vmatpush3.bf16.msra.mxu0 %v2888_v13 }
 0x3a3   :  { %2685 = vmatprep.subr.bf16.mxu0 %v2792_v8 }
 0x3a4   :  { %2684 = vmatpush3.bf16.msra.mxu1 %v2919_v20 }
 0x3a5   :  { %2458 = vmatmul.mubr.msk.f32.vlgmr.msra.gmra.mrb[14].mxu0 %vm197_vm3, %v2771_v21  ;;  %2691 = vmatprep.subr.bf16.mxu1 %v2792_v8 }
 0x3a6   :  { %2687 = vmatpush3.bf16.msra.mxu0 %v2939_v26  ;;  %2479 = vmatprep.mubr.msk.f32.mxu0 %vm2793_vm2, %v2794_v14 }
 0x3a7   :  { %2688 = vmatprep.subr.bf16.mxu0 %v2792_v8 }
 0x3aa   :  { %2690 = vmatpush3.bf16.msra.mxu0 %v2950_v28 }
 0x3ab   :  { %2697 = vmatprep.subr.bf16.mxu0 %v2792_v8 }
 0x470   :  { %v999_v22 = vpop.f32.mrb[12].mxu0 }
 0x471   :  { %v1072_v23 = vpop.f32.mrb[16].mxu1  ;;  %v2437_v24 = vpop.f32.mrb[13].mxu0 }
 0x472   :  { %v1073_v25 = vadd.f32 %v1072_v23, %v999_v22  ;;  %v2448_v27 = vpop.f32.mrb[17].mxu1 }
 0x474   :  { %v1076_v31 = vadd.f32 %v2994_v46, %v1073_v25 }
 0x476   :  { %2772 = vtanh.f32 %v1076_v31 }
 0x478   :  { %v1144_v36 = vpop.f32.mrb[14].mxu0 }
 0x479   :  { %v1148_v37 = vadd.f32 %v1144_v36, %v162_v34  ;;  %v2459_v38 = vpop.f32.mrb[15].mxu0 }
 0x47b   :  { %2774 = vtanh.f32 %v1148_v37 }
 0x480   :  { %v3077_v39 = vpop.eup %2772 }
 0x481   :  { %2469 = vmatmul.mubr.msk.f32.vlgmr.msra.gmra.mrb[18].mxu1 %vm197_vm3, %v3077_v39 }
 0x482   :  { %2693 = vmatpush3.bf16.msra.mxu1 %v2866_v6  ;;  %2490 = vmatprep.mubr.msk.f32.mxu1 %vm2793_vm2, %v2794_v14 }
 0x483   :  { %2694 = vmatprep.subr.bf16.mxu1 %v2792_v8 }
 0x485   :  { %v2775_v40 = vpop.eup %2774 }
 0x486   :  { %2696 = vmatpush3.bf16.msra.mxu1 %v2888_v13  ;;  %2480 = vmatmul.mubr.msk.f32.vlgmr.msra.gmra.mrb[16].mxu0 %vm197_vm3, %v2775_v40 }
 0x487   :  { %2699 = vmatpush3.bf16.msra.mxu0 %v2909_v17  ;;  %2703 = vmatprep.subr.bf16.mxu1 %v2792_v8 }
 0x488   :  { %2700 = vmatprep.subr.bf16.mxu0 %v2792_v8  ;;  %2501 = vmatprep.mubr.msk.f32.mxu0 %vm2793_vm2, %v2794_v14 }
 0x489   :  { %2491 = vmatmul.mubr.msk.f32.vlgmr.msra.gmra.mrb[20].mxu1 %vm197_vm3, %v2775_v40 }
 0x48a   :  { %2705 = vmatpush3.bf16.msra.mxu1 %v2939_v26  ;;  %2512 = vmatprep.mubr.msk.f32.mxu1 %vm2793_vm2, %v2794_v14 }
 0x48b   :  { %2702 = vmatpush3.bf16.msra.mxu0 %v2919_v20  ;;  %2706 = vmatprep.subr.bf16.mxu1 %v2792_v8 }
 0x48c   :  { %2709 = vmatprep.subr.bf16.mxu0 %v2792_v8 }
 0x48e   :  { %2708 = vmatpush3.bf16.msra.mxu1 %v2950_v28 }
 0x48f   :  { %2715 = vmatprep.subr.bf16.mxu1 %v2792_v8 }
 0x554   :  { %v1219_v30 = vpop.f32.mrb[18].mxu1 }
 0x555   :  { %v2470_v41 = vpop.f32.mrb[19].mxu1 }
 0x559   :  { %v1292_v42 = vpop.f32.mrb[16].mxu0 }
 0x55a   :  { %v1293_v43 = vadd.f32 %v1292_v42, %v1219_v30  ;;  %v2481_v44 = vpop.f32.mrb[17].mxu0 }
 0x55c   :  { %v1296_v47 = vadd.f32 %v2994_v46, %v1293_v43  ;;  %v1364_v48 = vpop.f32.mrb[20].mxu1 }
 0x55d   :  { %v1368_v49 = vadd.f32 %v1364_v48, %v167_v45  ;;  %v2492_v50 = vpop.f32.mrb[21].mxu1 }
 0x55e   :  { %2776 = vtanh.f32 %v1296_v47 }
 0x55f   :  { %2778 = vtanh.f32 %v1368_v49 }
 0x568   :  { %v3104_v51 = vpop.eup %2776 }
 0x569   :  { %v2779_v52 = vpop.eup %2778  ;;  %2502 = vmatmul.mubr.msk.f32.vlgmr.msra.gmra.mrb[18].mxu0 %vm197_vm3, %v3104_v51 }
 0x56a   :  { %2513 = vmatmul.mubr.msk.f32.vlgmr.msra.gmra.mrb[22].mxu1 %vm197_vm3, %v2779_v52  ;;  %2711 = vmatpush3.bf16.msra.mxu0 %v2866_v6 }
 0x56b   :  { %2712 = vmatprep.subr.bf16.mxu0 %v2792_v8  ;;  %2523 = vmatprep.mubr.msk.f32.mxu0 %vm2793_vm2, %v2794_v14 }
 0x56c   :  { %2717 = vmatpush3.bf16.msra.mxu1 %v2909_v17  ;;  %2534 = vmatprep.mubr.msk.f32.mxu1 %vm2793_vm2, %v2794_v14 }
 0x56d   :  { %2718 = vmatprep.subr.bf16.mxu1 %v2792_v8 }
 0x56e   :  { %2714 = vmatpush3.bf16.msra.mxu0 %v2888_v13 }
 0x56f   :  { %2721 = vmatprep.subr.bf16.mxu0 %v2792_v8 }
 0x570   :  { %2720 = vmatpush3.bf16.msra.mxu1 %v2919_v20 }
 0x571   :  { %2524 = vmatmul.mubr.msk.f32.vlgmr.msra.gmra.mrb[20].mxu0 %vm197_vm3, %v2779_v52  ;;  %2727 = vmatprep.subr.bf16.mxu1 %v2792_v8 }
 0x572   :  { %2723 = vmatpush3.bf16.msra.mxu0 %v2939_v26  ;;  %2545 = vmatprep.mubr.msk.f32.mxu0 %vm2793_vm2, %v2794_v14 }
 0x573   :  { %2724 = vmatprep.subr.bf16.mxu0 %v2792_v8 }
 0x576   :  { %2726 = vmatpush3.bf16.msra.mxu0 %v2950_v28 }
 0x577   :  { %2733 = vmatprep.subr.bf16.mxu0 %v2792_v8 }
 0x63c   :  { %v1439_v29 = vpop.f32.mrb[18].mxu0 }
 0x63d   :  { %v1512_v53 = vpop.f32.mrb[22].mxu1  ;;  %v2503_v54 = vpop.f32.mrb[19].mxu0 }
 0x63e   :  { %v1513_v56 = vadd.f32 %v1512_v53, %v1439_v29  ;;  %v2514_v57 = vpop.f32.mrb[23].mxu1 }
 0x640   :  { %v1516_v58 = vadd.f32 %v2994_v46, %v1513_v56 }
 0x642   :  { %2780 = vtanh.f32 %v1516_v58 }
 0x644   :  { %v1584_v60 = vpop.f32.mrb[20].mxu0 }
 0x645   :  { %v1588_v61 = vadd.f32 %v1584_v60, %v172_v59  ;;  %v2525_v62 = vpop.f32.mrb[21].mxu0 }
 0x647   :  { %2782 = vtanh.f32 %v1588_v61 }
 0x64c   :  { %v2781_v63 = vpop.eup %2780 }
 0x64d   :  { %2535 = vmatmul.mubr.msk.f32.vlgmr.msra.gmra.mrb[24].mxu1 %vm197_vm3, %v2781_v63 }
 0x64e   :  { %2729 = vmatpush3.bf16.msra.mxu1 %v2866_v6  ;;  %2556 = vmatprep.mubr.msk.f32.mxu1 %vm2793_vm2, %v2794_v14  ;;  %v1958_v6 = vld [vmem:[%s3196_s6] sm:$0xff] }
 0x64f   :  { %2730 = vmatprep.subr.bf16.mxu1 %v2792_v8 }
 0x651   :  { %v2783_v0 = vpop.eup %2782 }
 0x652   :  { %2732 = vmatpush3.bf16.msra.mxu1 %v2888_v13  ;;  %2546 = vmatmul.mubr.msk.f32.vlgmr.msra.gmra.mrb[22].mxu0 %vm197_vm3, %v2783_v0  ;;  %v1959_v13 = vld [vmem:[%s3196_s6 + $0x8] sm:$0xff] }
 0x653   :  { %2735 = vmatpush3.bf16.msra.mxu0 %v2909_v17  ;;  %2739 = vmatprep.subr.bf16.mxu1 %v2792_v8  ;;  %v2745_v17 = vpack.c.bf16 %v1959_v13, %v1958_v6  ;;  %v2161_v13 = vld [vmem:[%s3198_s8] ss:$0 sm:$0xff] }
 0x654   :  { %2736 = vmatprep.subr.bf16.mxu0 %v2792_v8  ;;  %2567 = vmatprep.mubr.msk.f32.mxu0 %vm2793_vm2, %v2794_v14 }
 0x655   :  { %2557 = vmatmul.mubr.msk.f32.vlgmr.msra.gmra.mrb[26].mxu1 %vm197_vm3, %v2783_v0 }
 0x656   :  { %2741 = vmatpush3.bf16.msra.mxu1 %v2939_v26  ;;  %2578 = vmatprep.mubr.msk.f32.mxu1 %vm2793_vm2, %v2794_v14 }
 0x657   :  { %2738 = vmatpush3.bf16.msra.mxu0 %v2919_v20  ;;  %2742 = vmatprep.subr.bf16.mxu1 %v2792_v8  ;;  %v177_v8 = vadd.f32 %v2969_v33, %v2967_v32 }
 0x658   :  { %2746 = vmatprep.subr.bf16.mxu0 %v2745_v17 }
 0x65a   :  { %2744 = vmatpush3.bf16.msra.mxu1 %v2950_v28 }
 0x720   :  { %v1659_v26 = vpop.f32.mrb[24].mxu1 }
 0x721   :  { %v2536_v35 = vpop.f32.mrb[25].mxu1 }
 0x725   :  { %v1732_v1 = vpop.f32.mrb[22].mxu0 }
 0x726   :  { %v1733_v14 = vadd.f32 %v1732_v1, %v1659_v26  ;;  %v2547_v3 = vpop.f32.mrb[23].mxu0 }
 0x728   :  { %v1736_v20 = vadd.f32 %v2994_v46, %v1733_v14  ;;  %v1804_v28 = vpop.f32.mrb[26].mxu1 }
 0x729   :  { %v1808_v4 = vadd.f32 %v1804_v28, %v177_v8  ;;  %v2558_v5 = vpop.f32.mrb[27].mxu1 }
 0x72a   :  { %2784 = vtanh.f32 %v1736_v20 }
 0x72b   :  { %2786 = vtanh.f32 %v1808_v4 }
 0x734   :  { %v2785_v11 = vpop.eup %2784 }
 0x735   :  { %v2787_v12 = vpop.eup %2786  ;;  %2568 = vmatmul.mubr.msk.f32.vlgmr.msra.gmra.mrb[24].mxu0 %vm197_vm3, %v2785_v11 }
 0x736   :  { %2579 = vmatmul.mubr.msk.f32.vlgmr.msra.gmra.mrb[28].mxu1 %vm197_vm3, %v2787_v12  ;;  %2748 = vmatpush3.bf16.msra.mxu0 %v2745_v17 }
 0x737   :  { %2589 = vmatprep.mubr.msk.f32.mxu0 %vm197_vm3, %v2998_v55  ;;  %2750 = vmatprep.subr.bf16.mxu0 %v2749_v10 }
 0x73a   :  { %2752 = vmatpush3.bf16.msra.mxu0 %v2749_v10 }
 0x73d   :  { %2590 = vmatmul.mubr.msk.f32.vlgmr.msra.gmra.mrb[26].mxu0 %vm197_vm3, %v3023_v2 }
 0x73e   :  { %2592 = vmatprep.mubr.msk.f32.mxu0 %vm197_vm3, %v3050_v19 }
 0x741   :  { %2593 = vmatmul.mubr.msk.f32.gmra.mrb[28].mxu0 %vm197_vm3, %v3077_v39 }
 0x742   :  { %2595 = vmatprep.mubr.msk.f32.mxu0 %vm197_vm3, %v3104_v51 }
 0x745   :  { %2596 = vmatmul.mubr.msk.f32.gmra.mrb[30].mxu0 %vm197_vm3, %v2781_v63 }
 0x746   :  { %2598 = vmatprep.mubr.msk.f32.mxu0 %vm197_vm3, %v2785_v11 }
 0x808   :  { %v1879_v32 = vpop.f32.mrb[24].mxu0 }
 0x809   :  { %v1952_v33 = vpop.f32.mrb[28].mxu1  ;;  %v2569_v55 = vpop.f32.mrb[25].mxu0 }
 0x80a   :  { %v1953_v15 = vadd.f32 %v1952_v33, %v1879_v32  ;;  %v2580_v16 = vpop.f32.mrb[29].mxu1 }
 0x80c   :  { %v1956_v2 = vadd.f32 %v2994_v46, %v1953_v15 }
 0x80e   :  { %2788 = vtanh.f32 %v1956_v2 }
 0x810   :  { %v2591_v19 = vpop.f32.mrb[26].mxu0 }
 0x811   :  { %v2044_v21 = vadd.f32 %v2591_v19, %v2152_v18  ;;  %v2038_v22 = vpop.f32.mrb[27].mxu0 }
 0x812   :  { %v2039_v23 = vadd.f32 %v2152_v18, %v2038_v22 }
 0x814   :  { %v2077_v24 = vmin.f32 %v2039_v23, %v2044_v21  ;;  %v2594_v25 = vpop.f32.mrb[28].mxu0 }
 0x815   :  { %v2048_v27 = vpop.f32.mrb[29].mxu0  ;;  %v2054_v36 = vadd.f32 %v2594_v25, %v2152_v18 }
 0x816   :  { %v2049_v31 = vadd.f32 %v2152_v18, %v2048_v27 }
 0x818   :  { %v2789_v34 = vpop.eup %2788  ;;  %v2078_v37 = vmin.f32 %v2077_v24, %v2049_v31  ;;  %v2597_v38 = vpop.f32.mrb[30].mxu0 }
 0x819   :  { %v2058_v39 = vpop.f32.mrb[31].mxu0  ;;  %2599 = vmatmul.mubr.msk.f32.gmra.mrb[32].mxu0 %vm197_vm3, %v2789_v34  ;;  %v2064_v30 = vadd.f32 %v2597_v38, %v2152_v18 }
 0x81a   :  { %v2059_v46 = vadd.f32 %v2152_v18, %v2058_v39  ;;  %v2079_v40 = vmin.f32 %v2078_v37, %v2054_v36 }
 0x81c   :  { %v2080_v41 = vmin.f32 %v2079_v40, %v2059_v46 }
 0x81e   :  { %v2081_v42 = vmin.f32 %v2080_v41, %v2064_v30 }
 0x8ec   :  { %v2600_v43 = vpop.f32.mrb[32].mxu0 }
 0x8ed   :  { %v2068_v44 = vpop.f32.mrb[33].mxu0  ;;  %v2074_v47 = vadd.f32 %v2600_v43, %v2152_v18 }
 0x8ee   :  { %v2069_v45 = vadd.f32 %v2152_v18, %v2068_v44 }
 0x8f0   :  { %v2082_v48 = vmin.f32 %v2081_v42, %v2069_v45 }
 0x8f2   :  { %v2083_v49 = vmin.f32 %v2082_v48, %v2074_v47 }
 0x8f4   :  { %v2084_v50 = vsub.f32 %v2039_v23, %v2083_v49  ;;  %v2085_v51 = vsub.f32 %v2044_v21, %v2083_v49  ;;  %v2087_v52 = vsub.f32 %v2049_v31, %v2083_v49  ;;  %v2089_v29 = vsub.f32 %v2054_v36, %v2083_v49 }
 0x8f5   :  { %v2091_v53 = vsub.f32 %v2059_v46, %v2083_v49  ;;  %v2093_v54 = vsub.f32 %v2064_v30, %v2083_v49  ;;  %v2095_v56 = vsub.f32 %v2069_v45, %v2083_v49  ;;  %v2097_v57 = vsub.f32 %v2074_v47, %v2083_v49 }
 0x8f6   :  { %v2086_v58 = vadd.f32 %v2085_v51, %v2084_v50 }
 0x8f8   :  { %v2088_v59 = vadd.f32 %v2087_v52, %v2086_v58 }
 0x8fa   :  { %v2090_v60 = vadd.f32 %v2089_v29, %v2088_v59 }
 0x8fc   :  { %v2092_v61 = vadd.f32 %v2091_v53, %v2090_v60 }
 0x8fe   :  { %v2094_v62 = vadd.f32 %v2093_v54, %v2092_v61 }
 0x900   :  { %v2096_v63 = vadd.f32 %v2095_v56, %v2094_v62 }
 0x902   :  { %v2098_v0 = vadd.f32 %v2097_v57, %v2096_v63 }
 0x904   :  { %2790 = vrcp.f32 %v2098_v0 }
 0x90e   :  { %v2791_v6 = vpop.eup %2790 }
 0x90f   :  { %v2100_v17 = vmul.f32 %v2791_v6, %v2084_v50 }
 0x911   :  { %v2108_v26 = vmul.f32 %v2161_v13, %v2100_v17 }
 0x913   :  { %v2110_v35 = vsel %vm2109_vm4, %v2108_v26, 0.0 }
 0x914   :  { %2111 = vadd.xlane.f32.xlu0 %v2110_v35 }
 0x9a1   :  { %v2112_v1 = vpop.xlane.xlu0 %2111 }
 0x9a2   :  { %2114 = vst.msk [vmem:[%s3199_s9] sm:$0xff] %vm2113_vm5, %v2112_v1 }

</bundles_post_ra>
